<compile_context>
chip_gen: v5e
topology: v5e:2x2
jax: 0.10.0
libtpu: 0.0.40
codegen_flags: <defaults>
</compile_context>

<pallas_src>
import jax
import jax.numpy as jnp
from jax import lax
from jax.experimental import pallas as pl
from jax.experimental.pallas import tpu as pltpu


def _round_up(x, m):
    return ((x + m - 1) // m) * m


def _choose_tiles(c, e, b):
    """Generation-aware M/N/K tile sizes (all multiples of 128)."""
    try:
        kind = jax.devices()[0].device_kind.lower()
    except Exception:
        kind = ""
    if ("v6" in kind) or ("v7" in kind):
        # 2x256x256 MXU; v7x has only 64 MiB VMEM -> keep tiles bounded.
        cap_mn, cap_k = 512, 1024
    else:
        # v5e & unknown: 4x128x128 MXU, 16 MiB default scoped VMEM.
        cap_mn, cap_k = 256, 512
    tm = min(_round_up(c, 128), cap_mn)
    tn = min(_round_up(e, 128), cap_mn)
    tk = min(_round_up(b, 128), cap_k)
    return tm, tn, tk


def _bmm_kernel(x1_ref, x2_ref, o_ref, acc_ref):
    """Compute one (tm, tn) output tile, accumulating over the K grid axis.

    x1_ref: (1, tk, tm) block of x1 in its ORIGINAL (a, b, c) layout, so the
            contraction axis (b) is the leading matrix axis (no HBM transpose).
    x2_ref: (1, tk, tn) block of x2 after the (2, 0, 1) permute -> (f, b, e).
    o_ref : (1, tm, tn) output tile; acc_ref: (tm, tn) f32 accumulator.
    """
    @pl.when(pl.program_id(3) == 0)
    def _():
        acc_ref[...] = jnp.zeros_like(acc_ref)

    # (tk, tm)^T @ (tk, tn) -> (tm, tn), contracting the leading (K) axis.
    acc_ref[...] += lax.dot_general(
        x1_ref[0], x2_ref[0],
        dimension_numbers=(((0,), (0,)), ((), ())),
        preferred_element_type=jnp.float32,
    )

    @pl.when(pl.program_id(3) == pl.num_programs(3) - 1)
    def _():
        o_ref[0] = acc_ref[...].astype(o_ref.dtype)


def model_forward(x1, x2, *, use_pallas=None, tile_override=None):
    """Pallas implementation of Model.forward(x1, x2)."""
    a, b, c = x1.shape
    d, e, f = x2.shape
    if b != d:
        raise ValueError(f"matmul contraction mismatch: {b} vs {d}")
    if not (a == f or a == 1 or f == 1):
        raise ValueError(f"batch dims not broadcastable: {a} vs {f}")
    B = max(a, f)

    # torch.matmul promotes mixed dtypes; mirror that.
    out_dtype = jnp.result_type(x1.dtype, x2.dtype)

    if use_pallas is None:
        # Tiny problems: grid-step overhead + masked (non-lane-dense) stores
        # dominate; XLA's fused batched matmul is faster.
        use_pallas = (c >= 128) and (e >= 128) and (b >= 32)
    if not use_pallas:
        return jnp.matmul(
            jnp.transpose(x1, (0, 2, 1)).astype(out_dtype),
            jnp.transpose(x2, (2, 0, 1)).astype(out_dtype),
        )

    # x1 keeps its original (a, b, c) layout (transpose folded into the kernel).
    # x2 needs a real relayout: (d, e, f) -> (f, d, e) == (f, b, e).
    x2p = jnp.transpose(x2, (2, 0, 1))
    if x1.dtype != out_dtype:
        x1 = x1.astype(out_dtype)
    if x2p.dtype != out_dtype:
        x2p = x2p.astype(out_dtype)

    if tile_override is not None:
        tm, tn, tk = tile_override
    else:
        tm, tn, tk = _choose_tiles(c, e, b)

    # Zero-pad ragged dims up to tile multiples (zeros in K are harmless;
    # padded M/N rows/cols are sliced off below).
    cp, ep, bp = _round_up(c, tm), _round_up(e, tn), _round_up(b, tk)
    if (bp, cp) != (b, c):
        x1 = jnp.pad(x1, ((0, 0), (0, bp - b), (0, cp - c)))
    if (bp, ep) != (b, e):
        x2p = jnp.pad(x2p, ((0, 0), (0, bp - b), (0, ep - e)))

    grid = (B, cp // tm, ep // tn, bp // tk)

    # Broadcast of the batch dim is expressed purely through the index_map.
    x1_bidx = (lambda bb: 0) if a == 1 else (lambda bb: bb)
    x2_bidx = (lambda bb: 0) if f == 1 else (lambda bb: bb)

    itemsize = jnp.dtype(out_dtype).itemsize
    vmem_needed = 2 * (tm * tk + tk * tn + tm * tn) * itemsize + tm * tn * 4
    vmem_limit = int(min(max(2 * vmem_needed, 32 << 20), 48 << 20))

    cost = pl.CostEstimate(
        flops=2 * B * cp * ep * bp,
        transcendentals=0,
        bytes_accessed=int((x1.size + x2p.size + B * cp * ep) * itemsize),
    )

    out_padded = pl.pallas_call(
        _bmm_kernel,
        out_shape=jax.ShapeDtypeStruct((B, cp, ep), out_dtype),
        grid=grid,
        in_specs=[
            pl.BlockSpec((1, tk, tm), lambda bb, m, n, k: (x1_bidx(bb), k, m)),
            pl.BlockSpec((1, tk, tn), lambda bb, m, n, k: (x2_bidx(bb), k, n)),
        ],
        out_specs=pl.BlockSpec((1, tm, tn), lambda bb, m, n, k: (bb, m, n)),
        scratch_shapes=[pltpu.VMEM((tm, tn), jnp.float32)],
        compiler_params=pltpu.CompilerParams(
            dimension_semantics=("parallel", "parallel", "parallel", "arbitrary"),
            vmem_limit_bytes=vmem_limit,
        ),
        cost_estimate=cost,
    )(x1, x2p)

    if (cp, ep) != (c, e):
        out_padded = out_padded[:, :c, :e]
    return out_padded


def _reference(x1, x2):
    """Pure-JAX reference of the PyTorch forward."""
    return jnp.matmul(jnp.transpose(x1, (0, 2, 1)), jnp.transpose(x2, (2, 0, 1)))


def _check(out, ref, tol=1e-2):
    # Relative Frobenius error; tolerant of MXU bf16-pass rounding on f32 inputs.
    err = jnp.linalg.norm((out - ref).astype(jnp.float32)) / (
        jnp.linalg.norm(ref.astype(jnp.float32)) + 1e-6
    )
    assert float(err) < tol, f"relative error too large: {float(err)}"


if __name__ == "__main__":
    key = jax.random.PRNGKey(0)
    k1, k2, k3, k4, k5, k6 = jax.random.split(key, 6)

    # 1) Pallas path with full M/N/K tiling exercised (grid = (2, 2, 2, 2)):
    #    x1 (2, 256, 256) -> (2, 256, 256);  x2 (256, 256, 2) -> (2, 256, 256)
    x1 = jax.random.normal(k1, (2, 256, 256), dtype=jnp.float32)
    x2 = jax.random.normal(k2, (256, 256, 2), dtype=jnp.float32)
    out = jax.block_until_ready(
        model_forward(x1, x2, use_pallas=True, tile_override=(128, 128, 128))
    )
    ref = _reference(x1, x2)
    assert out.shape == ref.shape == (2, 256, 256), (out.shape, ref.shape)
    _check(out, ref)

    # 2) Pallas path, broadcast batch (a == 1) + ragged dims (padding path).
    x1b = jax.random.normal(k3, (1, 96, 160), dtype=jnp.float32)
    x2b = jax.random.normal(k4, (96, 144, 2), dtype=jnp.float32)
    outb = jax.block_until_ready(model_forward(x1b, x2b, use_pallas=True))
    refb = _reference(x1b, x2b)
    assert outb.shape == refb.shape == (2, 160, 144), (outb.shape, refb.shape)
    _check(outb, refb)

    # 3) Tiny shapes -> XLA fallback (Pallas would be overhead-dominated here).
    x1s = jax.random.normal(k5, (1, 4, 8), dtype=jnp.float32)
    x2s = jax.random.normal(k6, (4, 16, 2), dtype=jnp.float32)
    outs = jax.block_until_ready(model_forward(x1s, x2s))
    refs = _reference(x1s, x2s)
    assert outs.shape == refs.shape == (2, 8, 16), (outs.shape, refs.shape)
    _check(outs, refs, tol=1e-4)

    print("KERNEL_OK")
</pallas_src>

<mosaic_0001>
module attributes {stable_mosaic.version = 11 : i64} {
  func.func @_bmm_kernel(%arg0: i32, %arg1: i32, %arg2: i32, %arg3: i32, %arg4: memref<1x128x128xf32, #tpu.memory_space<vmem>>, %arg5: memref<1x128x128xf32, #tpu.memory_space<vmem>>, %arg6: memref<1x128x128xf32, #tpu.memory_space<vmem>>, %arg7: memref<128x128xf32, #tpu.memory_space<vmem>>) attributes {dimension_semantics = [#tpu.dimension_semantics<parallel>, #tpu.dimension_semantics<parallel>, #tpu.dimension_semantics<parallel>, #tpu.dimension_semantics<arbitrary>], iteration_bounds = array<i64: 2, 2, 2, 2>, scalar_prefetch = 0 : i64, scratch_operands = 1 : i64, tpu.core_type = #tpu.core_type<tc>, window_params = [{transform_indices = @transform_0, window_bounds = array<i64: 1, 128, 128>}, {transform_indices = @transform_1, window_bounds = array<i64: 1, 128, 128>}, {transform_indices = @transform_2, window_bounds = array<i64: 1, 128, 128>}]} {
    %c0_i32 = arith.constant 0 : i32
    %0 = arith.cmpi eq, %arg3, %c0_i32 : i32
    %1 = arith.extui %0 : i1 to i32
    %c0_i32_0 = arith.constant 0 : i32
    %2 = arith.cmpi ne, %1, %c0_i32_0 : i32
    scf.if %2 {
      %cst_11 = arith.constant 0.000000e+00 : f32
      %14 = vector.broadcast %cst_11 : f32 to vector<128x128xf32>
      %c0_12 = arith.constant 0 : index
      %c0_13 = arith.constant 0 : index
      %15 = vector.load %arg7[%c0_12, %c0_13] : memref<128x128xf32, #tpu.memory_space<vmem>>, vector<128x128xf32>
      tpu.vector_store %arg7[%c0_12, %c0_13], %14 {strides = array<i32>} : memref<128x128xf32, #tpu.memory_space<vmem>>, vector<128x128xf32>,
    } else {
    }
    %c0 = arith.constant 0 : index
    %c0_1 = arith.constant 0 : index
    %3 = vector.load %arg7[%c0, %c0_1] : memref<128x128xf32, #tpu.memory_space<vmem>>, vector<128x128xf32>
    %c0_2 = arith.constant 0 : index
    %c0_3 = arith.constant 0 : index
    %c0_4 = arith.constant 0 : index
    %4 = vector.load %arg4[%c0_2, %c0_3, %c0_4] : memref<1x128x128xf32, #tpu.memory_space<vmem>>, vector<1x128x128xf32>
    %5 = vector.shape_cast %4 : vector<1x128x128xf32> to vector<128x128xf32>
    %c0_5 = arith.constant 0 : index
    %c0_6 = arith.constant 0 : index
    %c0_7 = arith.constant 0 : index
    %6 = vector.load %arg5[%c0_5, %c0_6, %c0_7] : memref<1x128x128xf32, #tpu.memory_space<vmem>>, vector<1x128x128xf32>
    %7 = vector.shape_cast %6 : vector<1x128x128xf32> to vector<128x128xf32>
    %cst = arith.constant dense<0.000000e+00> : vector<128x128xf32>
    %8 = tpu.matmul %5, %7, %cst {dimension_numbers = #tpu.dot_dimension_numbers<[0], [0], [1], [1], [0, 1, 1, 1], [], []>} : vector<128x128xf32>, vector<128x128xf32>, vector<128x128xf32> -> vector<128x128xf32>
    %9 = arith.addf %3, %8 : vector<128x128xf32>
    %c0_8 = arith.constant 0 : index
    %c0_9 = arith.constant 0 : index
    %10 = vector.load %arg7[%c0_8, %c0_9] : memref<128x128xf32, #tpu.memory_space<vmem>>, vector<128x128xf32>
    tpu.vector_store %arg7[%c0_8, %c0_9], %9 {strides = array<i32>} : memref<128x128xf32, #tpu.memory_space<vmem>>, vector<128x128xf32>,
    %c1_i32 = arith.constant 1 : i32
    %11 = arith.cmpi eq, %arg3, %c1_i32 : i32
    %12 = arith.extui %11 : i1 to i32
    %c0_i32_10 = arith.constant 0 : i32
    %13 = arith.cmpi ne, %12, %c0_i32_10 : i32
    scf.if %13 {
      %c0_11 = arith.constant 0 : index
      %c0_12 = arith.constant 0 : index
      %14 = vector.load %arg7[%c0_11, %c0_12] : memref<128x128xf32, #tpu.memory_space<vmem>>, vector<128x128xf32>
      %c0_13 = arith.constant 0 : index
      %c0_14 = arith.constant 0 : index
      %c0_15 = arith.constant 0 : index
      %15 = vector.load %arg6[%c0_13, %c0_14, %c0_15] : memref<1x128x128xf32, #tpu.memory_space<vmem>>, vector<1x128x128xf32>
      %16 = vector.shape_cast %15 : vector<1x128x128xf32> to vector<128x128xf32>
      %17 = vector.shape_cast %14 : vector<128x128xf32> to vector<1x128x128xf32>
      tpu.vector_store %arg6[%c0_13, %c0_14, %c0_15], %17 {strides = array<i32>} : memref<1x128x128xf32, #tpu.memory_space<vmem>>, vector<1x128x128xf32>,
    } else {
    }
    return
  }
  func.func @transform_0(%arg0: i32, %arg1: i32, %arg2: i32, %arg3: i32) -> (i32, i32, i32) {
    %c0_i32 = arith.constant 0 : i32
    return %arg0, %arg3, %arg1 : i32, i32, i32
  }
  func.func @transform_1(%arg0: i32, %arg1: i32, %arg2: i32, %arg3: i32) -> (i32, i32, i32) {
    %c0_i32 = arith.constant 0 : i32
    return %arg0, %arg3, %arg2 : i32, i32, i32
  }
  func.func @transform_2(%arg0: i32, %arg1: i32, %arg2: i32, %arg3: i32) -> (i32, i32, i32) {
    %c0_i32 = arith.constant 0 : i32
    return %arg0, %arg1, %arg2 : i32, i32, i32
  }
}

</mosaic_0001>

<bundles_post_ra>
// kernel: tpu_custom_call.1
= control target key start
LH: loop header
LB: loop body
LE: loop exit
PB: predicated region body
PF: predicated region fallthrough
CT: control target
= control target key end

     0   :  { %s1548_s0 = inlined_call_operand.hbm [shape: f32[2,256,256], index: 0, kind: input, shape index: {}]   ;;  %s1549_s1 = inlined_call_operand.hbm [shape: f32[2,256,256], index: 1, kind: input, shape index: {}]   ;;  %s1550_s2 = inlined_call_operand.hbm [shape: f32[2,256,256], index: 2, kind: output, shape index: {}]  }
   0x1   :  { %1574 = sst [smem:[#allocation29_spill]] %s1548_s0 }
   0x2   :  { %1575 = sst [smem:[#allocation30_spill]] %s1549_s1 }
   0x3   :  { %1576 = sst [smem:[#allocation31_spill]] %s1550_s2 }
   0x4   :  { %7 = vsyncpa [#allocation4], 0 }
   0x5   :  { %9 = vsyncpa [#allocation4 + $0x1], 0 }
   0x6   :  { %10 = vsyncpa [#allocation7], 0 }
   0x7   :  { %12 = vsyncpa [#allocation7 + $0x1], 0 }
   0x8   :  { %13 = vsyncpa [#allocation5], 0 }
   0x9   :  { %15 = vsyncpa [#allocation5 + $0x1], 0  ;;  %s1153_s9 = smov 0   ;;  %s1155_s10 = smov 0  }
   0xa   :  { %s1157_s11 = smov 0   ;;  %s1159_s12 = smov 0  }
   0xb   :  { %s1161_s13 = smov 0   ;;  %s1163_s14 = smov 0  }
   0xc   :  { %s1165_s15 = smov 0   ;;  %s1167_s16 = smov 0  }
   0xd   :  { %s1169_s17 = smov 0   ;;  %s1171_s18 = smov 0  }
   0xe   :  { %s1173_s19 = smov 0   ;;  %s1175_s20 = smov 0  }
   0xf   :  { %s1177_s21 = smov 0   ;;  %s1179_s22 = smov 0  }
  0x10   :  { %s1181_s23 = smov 0   ;;  %s1183_s24 = smov 0  }
  0x11   :  { %s1185_s25 = smov 0   ;;  %s1187_s26 = smov 0  }
  0x12 LB: > { %1577 = sst [smem:[#allocation12_spill]] %s1061_s9  ;;  %s639_s27 = sadd.s32 4294967295, %s1129_s26   ;;  %s1129_s26 = sphi %s1187_s26, %s21_s26   ;;  %s1125_s25 = sphi %s1185_s25, %s1649_s25   ;;  %s1121_s24 = sphi %s1183_s24, %s1637_s24   ;;  %s1117_s23 = sphi %s1181_s23, %s1648_s23   ;;  %s1113_s22 = sphi %s1179_s22, %s1635_s22   ;;  %s1109_s21 = sphi %s1177_s21, %s1647_s21   ;;  %s1105_s20 = sphi %s1175_s20, %s1634_s20   ;;  %s1101_s19 = sphi %s1173_s19, %s1633_s19   ;;  %s1097_s18 = sphi %s1171_s18, %s1632_s18   ;;  %s1093_s17 = sphi %s1169_s17, %s1646_s17   ;;  %s1089_s16 = sphi %s1167_s16, %s1645_s16   ;;  %s1085_s15 = sphi %s1165_s15, %s1644_s15   ;;  %s1081_s14 = sphi %s1163_s14, %s1643_s14   ;;  %s1077_s13 = sphi %s1161_s13, %s1642_s13   ;;  %s1073_s12 = sphi %s1159_s12, %s1641_s12   ;;  %s1069_s11 = sphi %s1157_s11, %s1640_s11   ;;  %s1065_s10 = sphi %s1155_s10, %s1639_s10   ;;  %s1061_s9 = sphi %s1153_s9, %s1631_s9  }
  0x13   : > { %1578 = sst [smem:[#allocation13_spill]] %s1065_s10  ;;  %s36_s28 = sadd.s32 1, %s1113_s22 }
  0x14   : > { %1579 = sst [smem:[#allocation14_spill]] %s1097_s18  ;;  %p1243_p0 = scmp.ge.s32.totalorder %s36_s28, 2 }
  0x15   : > { %1580 = sst [smem:[#allocation15_spill]] %s1101_s19  ;;  %p65_p1 = scmp.ne.s32.totalorder %s1093_s17, %s1089_s16 }
  0x16   : > { %1581 = sst [smem:[#allocation16_spill]] %s1105_s20  ;;  %s1651_s28 = smov (%p1243_p0, %s36_s28), 0 }
  0x17   : > { %1582 = sst [smem:[#allocation17_spill]] %s1109_s21  ;;  %p66_p2 = scmp.eq.s32.totalorder %s1129_s26, 0 }
  0x18   : > { %1583 = sst [smem:[#allocation18_spill]] %s1113_s22  ;;  %p71_p3 = scmp.ne.s32.totalorder %s1089_s16, %s1085_s15 }
  0x19   : > { %1584 = sst [smem:[#allocation19_spill]] %s1117_s23  ;;  %p1262_p4 = por %p66_p2, %p65_p1 }
  0x1a   : > { %1585 = sst [smem:[#allocation20_spill]] %s1121_s24  ;;  %p1266_p5 = scmp.eq.s32.totalorder %s639_s27, 0 }
  0x1b   : > { %1587 = sst [smem:[#allocation21_spill]] %s1651_s28  ;;  %p1270_p6 = scmp.eq.s32.totalorder %s639_s27, 15 }
  0x1c   : > { %p1276_p7 = por %p1266_p5, %p71_p3  ;;  %p734_p8 = scmp.lt.s32.totalorder %s1129_s26, 16 }
  0x1d   : > { %s155_s15 = sand.u32 1, %s1093_s17   ;;  %s1554_s5 = sshll.u32 %s1113_s22, 5 }
  0x1e   : > { %s1591_s4 = scalar_select %p1276_p7, 1, 0 }
  0x1f   : > { %s643_s3 = sshll.u32 %s155_s15, 7  ;;  %s164_s30 = sadd.s32 %s1121_s24, %s1554_s5 }
  0x20   : > { %1592 = sst [smem:[#allocation22_spill]] %s1591_s4  ;;  %s1558_s2 = sshll.u32 %s1125_s25, 6 }
  0x21   : > { %s159_s21 = scalar_lea.vmem [#allocation3], %s643_s3  ;;  %s166_s27 = sadd.s32 %s1558_s2, %s164_s30 }
  0x22   : > { %s171_s19 = sshll.u32 %s159_s21, 4  ;;  %s647_s20 = sshll.u32 %s166_s27, 3  ;;  %s172_s19 = int_to_ptr.vmem [resolvable:$true] %s171_s19 }
  0x23   : > { %p724_p9 = pnand %p734_p8, %p1262_p4  ;;  %s1593_s0 = sld [smem:[#allocation29_spill]] }
  0x24   : > { %p653_p10 = scmp.ge.s32.totalorder %s1129_s26, 1  ;;  %s156_s21 = scalar_lea.sflag [#allocation4], %s155_s15 }
  0x25   : > { %s1555_s30 = smov 256   ;;  %s1556_s6 = smov 128  }
  0x26   : > { %s1557_s27 = smov 8   ;;  %p205_p11 = scmp.lt.s32.totalorder %s1129_s26, 17 }
  0x27   : > { %s39_s4 = sadd.s32 1, %s1117_s23  ;;  %p95_p13 = scmp.ne.s32.totalorder %s1081_s14, %s1077_s13 }
  0x28   : > { %p1301_p12 = pnand %p653_p10, %p205_p11  ;;  %s1653_s4 = smov (!%p1243_p0, %s39_s4), %s1117_s23 }
  0x29   : > { %s168_s5 = scalar_lea.hbm %s1593_s0, %s647_s20  ;;  %s640_s20 = sadd.s32 4294967294, %s1129_s26  }
  0x2a   : > { %s169_s3 = sshll.u32 %s168_s5, 4  ;;  %p41_p1 = scmp.ge.s32.totalorder %s1653_s4, 2  ;;  %s170_s3 = int_to_ptr.hbm [resolvable:$true] %s169_s3 }
  0x2b   : > { %726 = dma.hbm_to_vmem [thread:$0]  (!%p724_p9), %s170_s3, 2048, %s172_s19, %s156_s21, %s1555_s30, %s1556_s6, %s1557_s27  }
  0x2c   : > { %p101_p3 = scmp.ne.s32.totalorder %s1077_s13, %s1073_s12  ;;  %p1317_p4 = por %p95_p13, %p66_p2 }
  0x2d   : > { %s1655_s4 = smov (%p41_p1, %s1653_s4), 0  ;;  %s1597_s29 = sadd.s32 1, %s1121_s24 }
  0x2e   : > { %1596 = sst [smem:[#allocation23_spill]] %s1655_s4  ;;  %s1657_s29 = smov (!%p41_p1, %s1597_s29), %s1121_s24 }
  0x2f   : > { %s84_s3 = ssub.s32 %s1117_s23, %s1655_s4  ;;  %p1331_p0 = por %p101_p3, %p1266_p5 }
  0x30   : > { %p45_p2 = scmp.ge.s32.totalorder %s1657_s29, 2  ;;  %p128_p9 = scmp.ne.s32.totalorder %s1069_s11, %s1065_s10 }
  0x31   : > { %s1598_s21 = scalar_select %p1331_p0, 1, 0 }
  0x32   : > { %p134_p10 = scmp.ne.s32.totalorder %s1065_s10, %s1061_s9  ;;  %p135_p11 = scmp.eq.s32.totalorder %s640_s20, 15 }
  0x33   : > { %1599 = sst [smem:[#allocation24_spill]] %s1598_s21  ;;  %s1659_s29 = smov (%p45_p2, %s1657_s29), 0 }
  0x34   : > { %1600 = sst [smem:[#allocation25_spill]] %s1659_s29  ;;  %s1601_s12 = sadd.s32 1, %s1125_s25 }
  0x35   : > { %s1661_s12 = smov (!%p45_p2, %s1601_s12), %s1125_s25  ;;  %s54_s30 = ssub.s32 %s1121_s24, %s1659_s29 }
  0x36   : > { %p1348_p13 = por %p1270_p6, %p128_p9  ;;  %p49_p5 = scmp.ge.s32.totalorder %s1661_s12, 2 }
  0x37   : > { %p1352_p1 = por %p135_p11, %p134_p10  ;;  %s181_s20 = sand.u32 1, %s1081_s14  }
  0x38   : > { %s1602_s7 = scalar_select %p1348_p13, 1, 0 }
  0x39   : > { %s1604_s6 = scalar_select %p1352_p1, 1, 0 }
  0x3a   : > { %1603 = sst [smem:[#allocation26_spill]] %s1602_s7  ;;  %s1606_s27 = sshll.u32 %s1113_s22, 5 }
  0x3b   : > { %1605 = sst [smem:[#allocation27_spill]] %s1604_s6  ;;  %s190_s15 = sadd.s32 %s1117_s23, %s1606_s27 }
  0x3c   : > { %s1663_s12 = smov (%p49_p5, %s1661_s12), 0  ;;  %s648_s8 = sshll.u32 %s181_s20, 7 }
  0x3d   : > { %1607 = sst [smem:[#allocation28_spill]] %s1663_s12  ;;  %s51_s5 = ssub.s32 %s1125_s25, %s1663_s12 }
  0x3e   : > { %s1608_s2 = ssub.s32 %s1113_s22, %s1651_s28  ;;  %s113_s29 = sor.u32 %s54_s30, %s51_s5 }
  0x3f   : > { %s53_s0 = sor.u32 %s1608_s2, %s51_s5  ;;  %s115_s6 = sor.u32 %s113_s29, %s84_s3 }
  0x40   : > { %s55_s4 = sor.u32 %s54_s30, %s53_s0  ;;  %s85_s24 = sor.u32 %s84_s3, %s53_s0 }
  0x41   : > { %p56_p6 = scmp.eq.s32.totalorder %s55_s4, 0  ;;  %p86_p3 = scmp.eq.s32.totalorder %s85_s24, 0 }
  0x42   : > { %s1609_s9 = sshll.u32 %s1125_s25, 6  ;;  %s1610_s27 = sadd.s32 1, %s1093_s17 }
  0x43   : > { %s192_s7 = sadd.s32 %s1609_s9, %s190_s15  ;;  %s1611_s10 = sadd.s32 1, %s1081_s14 }
  0x44   : > { %s1372_s23 = scalar_select %p56_p6, %s1093_s17, %s1610_s27  }
  0x45   : > { %s1377_s21 = scalar_select %p86_p3, %s1081_s14, %s1611_s10  }
  0x46   : > { %p116_p2 = scmp.eq.s32.totalorder %s115_s6, 0  ;;  %s652_s12 = sshll.u32 %s192_s7, 3 }
  0x47   : > { %s1612_s1 = sld [smem:[#allocation30_spill]]  ;;  %s185_s0 = scalar_lea.vmem [#allocation6], %s648_s8 }
  0x48   : > { %s197_s5 = sshll.u32 %s185_s0, 4  ;;  %s1613_s22 = sadd.s32 1, %s1069_s11  ;;  %s198_s5 = int_to_ptr.vmem [resolvable:$true] %s197_s5 }
  0x49   : > { %s1385_s4 = scalar_select %p116_p2, %s1069_s11, %s1613_s22  }
  0x4a   : > { %p727_p9 = pnand %p734_p8, %p1317_p4  ;;  %s182_s9 = scalar_lea.sflag [#allocation7], %s181_s20 }
  0x4b   : > { %s1614_s10 = smov 8   ;;  %s1615_s15 = smov 128  }
  0x4c   : > { %s1616_s6 = smov 256   ;;  %209 = sbr.rel (%p1301_p12) target bundleno = 582 (0x246), region = 28 }
  0x4d   : > { %s194_s30 = scalar_lea.hbm %s1612_s1, %s652_s12  ;;  %s211_s29 = sand.u32 (!%p1301_p12), 1, %s1089_s16  }
  0x4e   : > { %s195_s24 = sshll.u32 %s194_s30, 4  ;;  %s654_s3 = sshll.u32 (!%p1301_p12), %s211_s29, 7  ;;  %s196_s24 = int_to_ptr.hbm [resolvable:$true] %s195_s24 }
  0x4f   : > { %729 = dma.hbm_to_vmem [thread:$0]  (!%p727_p9), %s196_s24, 2048, %s198_s5, %s182_s9, %s1616_s6, %s1615_s15, %s1614_s10  }
  0x50   : > { %s212_s22 = scalar_lea.sflag (!%p1301_p12), [#allocation4], %s211_s29  ;;  %s1397_s12 = scalar_lea.vmem (!%p1301_p12), [#allocation3], %s654_s3 }
  0x51   : > { %1048 = dma.done.wait (%p1276_p7), %s212_s22, 2048  }
  0x52   : > { %1050 = vsyncadd (%p1276_p7), %s212_s22, 4294965248  ;;  %s221_s7 = sand.u32 1, %s1077_s13  }
  0x53   : > { %s655_s20 = sshll.u32 %s221_s7, 7  ;;  %s222_s8 = scalar_lea.sflag [#allocation7], %s221_s7 }
  0x54   : > { %s1404_s27 = scalar_lea.vmem [#allocation6], %s655_s20 }
  0x55   : > { %1052 = dma.done.wait (%p1331_p0), %s222_s8, 2048  }
  0x56   : > { %1054 = vsyncadd (%p1331_p0), %s222_s8, 4294965248  ;;  %s1619_s18 = sld [smem:[#allocation13_spill]] }
  0x57   : > { %s1620_s5 = sld [smem:[#allocation14_spill]] }
  0x5c   : > { %s249_s2 = sand.u32 1, %s1619_s18  }
  0x5d   : > { %s656_s30 = sshll.u32 %s249_s2, 7  ;;  %p657_p7 = scmp.ne.s32.totalorder %s1620_s5, 0 }
  0x5e   : > { %s1413_s0 = scalar_lea.vmem [#allocation8], %s656_s30 }
  0x5f   : > { %258 = sbr.rel (%p657_p7) target bundleno = 117 (0x75), region = 40 }
  0x64   : > { %v1134_v0 = vmov 0.0  }
  0x65   : > { %259 = vst [vmem:[#allocation2 + $0x30] sm:$0xff] %v1134_v0 }
  0x66   : > { %260 = vst [vmem:[#allocation2] sm:$0xff] %v1134_v0 }
  0x67   : > { %261 = vst [vmem:[#allocation2 + $0x58] sm:$0xff] %v1134_v0 }
  0x68   : > { %262 = vst [vmem:[#allocation2 + $0x18] sm:$0xff] %v1134_v0 }
  0x69   : > { %263 = vst [vmem:[#allocation2 + $0x50] sm:$0xff] %v1134_v0 }
  0x6a   : > { %264 = vst [vmem:[#allocation2 + $0x68] sm:$0xff] %v1134_v0 }
  0x6b   : > { %265 = vst [vmem:[#allocation2 + $0x8] sm:$0xff] %v1134_v0 }
  0x6c   : > { %266 = vst [vmem:[#allocation2 + $0x48] sm:$0xff] %v1134_v0 }
  0x6d   : > { %267 = vst [vmem:[#allocation2 + $0x40] sm:$0xff] %v1134_v0 }
  0x6e   : > { %268 = vst [vmem:[#allocation2 + $0x20] sm:$0xff] %v1134_v0 }
  0x6f   : > { %269 = vst [vmem:[#allocation2 + $0x10] sm:$0xff] %v1134_v0 }
  0x70   : > { %270 = vst [vmem:[#allocation2 + $0x38] sm:$0xff] %v1134_v0 }
  0x71   : > { %271 = vst [vmem:[#allocation2 + $0x60] sm:$0xff] %v1134_v0 }
  0x72   : > { %272 = vst [vmem:[#allocation2 + $0x70] sm:$0xff] %v1134_v0 }
  0x73   : > { %273 = vst [vmem:[#allocation2 + $0x78] sm:$0xff] %v1134_v0 }
  0x74   : > { %274 = vst [vmem:[#allocation2 + $0x28] sm:$0xff] %v1134_v0 }
  0x75 PF: > { %v291_v1 = vld [vmem:[%s1397_s12] sm:$0xff]  ;;  %v292_v2 = vld [vmem:[%s1397_s12 + $0x8] sm:$0xff]  ;;  %v293_v3 = vld [vmem:[%s1397_s12 + $0x10] sm:$0xff]  ;;  %s1621_s24 = sld [smem:[#allocation14_spill]] }
  0x76   : > { %323 = vxpose.xlu0.b32.start [1/16] %v291_v1, 128  ;;  %v294_v4 = vld [vmem:[%s1397_s12 + $0x18] sm:$0xff]  ;;  %v295_v5 = vld [vmem:[%s1397_s12 + $0x20] sm:$0xff]  ;;  %v296_v6 = vld [vmem:[%s1397_s12 + $0x28] sm:$0xff] }
  0x77   : > { %v297_v7 = vld [vmem:[%s1397_s12 + $0x30] sm:$0xff]  ;;  %v298_v8 = vld [vmem:[%s1397_s12 + $0x38] sm:$0xff]  ;;  %v299_v9 = vld [vmem:[%s1397_s12 + $0x40] sm:$0xff] }
  0x78   : > { %v300_v10 = vld [vmem:[%s1397_s12 + $0x48] sm:$0xff]  ;;  %v301_v11 = vld [vmem:[%s1397_s12 + $0x50] sm:$0xff]  ;;  %v302_v12 = vld [vmem:[%s1397_s12 + $0x58] sm:$0xff] }
  0x79   : > { %v322_v13 = vld [vmem:[%s1404_s27 + $0x78] sm:$0xff]  ;;  %v321_v14 = vld [vmem:[%s1404_s27 + $0x70] sm:$0xff]  ;;  %v320_v15 = vld [vmem:[%s1404_s27 + $0x68] sm:$0xff] }
  0x7a   : > { %355 = vmatpush.msra.mxu0 %v322_v13  ;;  %669 = vmatpush.msra.mxu1 %v322_v13  ;;  %v319_v16 = vld [vmem:[%s1404_s27 + $0x60] sm:$0xff]  ;;  %v318_v18 = vld [vmem:[%s1404_s27 + $0x58] sm:$0xff]  ;;  %v317_v19 = vld [vmem:[%s1404_s27 + $0x50] sm:$0xff] }
  0x7b   : > { %670 = vmatpush.msra.mxu2 %v322_v13  ;;  %671 = vmatpush.msra.mxu3 %v322_v13  ;;  %v303_v17 = vld [vmem:[%s1397_s12 + $0x60] sm:$0xff]  ;;  %v316_v20 = vld [vmem:[%s1404_s27 + $0x48] sm:$0xff]  ;;  %v314_v23 = vld [vmem:[%s1404_s27 + $0x38] sm:$0xff]  ;;  %p658_p8 = scmp.ne.s32.totalorder %s1621_s24, 1 }
  0x7c   : > { %356 = vmatpush.msra.mxu0 %v321_v14  ;;  %672 = vmatpush.msra.mxu1 %v321_v14  ;;  %v315_v21 = vld [vmem:[%s1404_s27 + $0x40] sm:$0xff]  ;;  %v304_v22 = vld [vmem:[%s1397_s12 + $0x68] sm:$0xff]  ;;  %v313_v24 = vld [vmem:[%s1404_s27 + $0x30] sm:$0xff] }
  0x7d   : > { %673 = vmatpush.msra.mxu2 %v321_v14  ;;  %674 = vmatpush.msra.mxu3 %v321_v14  ;;  %v312_v25 = vld [vmem:[%s1404_s27 + $0x28] sm:$0xff]  ;;  %v311_v26 = vld [vmem:[%s1404_s27 + $0x20] sm:$0xff]  ;;  %v305_v27 = vld [vmem:[%s1397_s12 + $0x70] sm:$0xff] }
  0x7e   : > { %324 = vxpose.xlu0.b32.cont [2/16] %v292_v2, 128  ;;  %357 = vmatpush.msra.mxu0 %v320_v15  ;;  %v310_v28 = vld [vmem:[%s1404_s27 + $0x18] sm:$0xff]  ;;  %v309_v29 = vld [vmem:[%s1404_s27 + $0x10] sm:$0xff]  ;;  %v308_v30 = vld [vmem:[%s1404_s27 + $0x8] sm:$0xff] }
  0x7f   : > { %675 = vmatpush.msra.mxu1 %v320_v15  ;;  %676 = vmatpush.msra.mxu2 %v320_v15  ;;  %v306_v31 = vld [vmem:[%s1397_s12 + $0x78] sm:$0xff]  ;;  %v307_v32 = vld [vmem:[%s1404_s27] sm:$0xff]  ;;  %v275_v49 = vld [vmem:[#allocation2 + $0x30] sm:$0xff] }
  0x80   : > { %677 = vmatpush.msra.mxu3 %v320_v15  ;;  %358 = vmatpush.msra.mxu0 %v319_v16  ;;  %v276_v52 = vld [vmem:[#allocation2] sm:$0xff]  ;;  %v277_v55 = vld [vmem:[#allocation2 + $0x58] sm:$0xff]  ;;  %v279_v61 = vld [vmem:[#allocation2 + $0x50] sm:$0xff] }
  0x81   : > { %678 = vmatpush.msra.mxu1 %v319_v16  ;;  %679 = vmatpush.msra.mxu2 %v319_v16  ;;  %v278_v58 = vld [vmem:[#allocation2 + $0x18] sm:$0xff]  ;;  %v280_v0 = vld [vmem:[#allocation2 + $0x68] sm:$0xff]  ;;  %v285_v15 = vld [vmem:[#allocation2 + $0x10] sm:$0xff] }
  0x82   : > { %359 = vmatpush.msra.mxu0 %v318_v18  ;;  %680 = vmatpush.msra.mxu3 %v319_v16 }
  0x83   : > { %681 = vmatpush.msra.mxu1 %v318_v18  ;;  %682 = vmatpush.msra.mxu2 %v318_v18 }
  0x84   : > { %360 = vmatpush.msra.mxu0 %v317_v19  ;;  %683 = vmatpush.msra.mxu3 %v318_v18  ;;  %v286_v18 = vld [vmem:[#allocation2 + $0x38] sm:$0xff] }
  0x85   : > { %684 = vmatpush.msra.mxu1 %v317_v19  ;;  %685 = vmatpush.msra.mxu2 %v317_v19 }
  0x86   : > { %325 = vxpose.xlu0.b32.cont [3/16] %v293_v3, 128  ;;  %361 = vmatpush.msra.mxu0 %v316_v20  ;;  %v281_v3 = vld [vmem:[#allocation2 + $0x8] sm:$0xff] }
  0x87   : > { %687 = vmatpush.msra.mxu1 %v316_v20  ;;  %688 = vmatpush.msra.mxu2 %v316_v20 }
  0x88   : > { %686 = vmatpush.msra.mxu3 %v317_v19  ;;  %362 = vmatpush.msra.mxu0 %v315_v21 }
  0x89   : > { %690 = vmatpush.msra.mxu1 %v315_v21  ;;  %691 = vmatpush.msra.mxu2 %v315_v21 }
  0x8a   : > { %363 = vmatpush.msra.mxu0 %v314_v23  ;;  %689 = vmatpush.msra.mxu3 %v316_v20 }
  0x8b   : > { %693 = vmatpush.msra.mxu1 %v314_v23  ;;  %694 = vmatpush.msra.mxu2 %v314_v23 }
  0x8c   : > { %364 = vmatpush.msra.mxu0 %v313_v24  ;;  %692 = vmatpush.msra.mxu3 %v315_v21  ;;  %v287_v21 = vld [vmem:[#allocation2 + $0x60] sm:$0xff] }
  0x8d   : > { %696 = vmatpush.msra.mxu1 %v313_v24  ;;  %697 = vmatpush.msra.mxu2 %v313_v24 }
  0x8e   : > { %326 = vxpose.xlu0.b32.cont [4/16] %v294_v4, 128  ;;  %365 = vmatpush.msra.mxu0 %v312_v25 }
  0x8f   : > { %699 = vmatpush.msra.mxu1 %v312_v25  ;;  %700 = vmatpush.msra.mxu2 %v312_v25 }
  0x90   : > { %695 = vmatpush.msra.mxu3 %v314_v23  ;;  %366 = vmatpush.msra.mxu0 %v311_v26 }
  0x91   : > { %702 = vmatpush.msra.mxu1 %v311_v26  ;;  %703 = vmatpush.msra.mxu2 %v311_v26 }
  0x92   : > { %367 = vmatpush.msra.mxu0 %v310_v28  ;;  %698 = vmatpush.msra.mxu3 %v313_v24  ;;  %v288_v24 = vld [vmem:[#allocation2 + $0x70] sm:$0xff] }
  0x93   : > { %705 = vmatpush.msra.mxu1 %v310_v28  ;;  %706 = vmatpush.msra.mxu2 %v310_v28 }
  0x94   : > { %368 = vmatpush.msra.mxu0 %v309_v29  ;;  %701 = vmatpush.msra.mxu3 %v312_v25 }
  0x95   : > { %708 = vmatpush.msra.mxu1 %v309_v29  ;;  %709 = vmatpush.msra.mxu2 %v309_v29 }
  0x96   : > { %327 = vxpose.xlu0.b32.cont [5/16] %v295_v5, 128  ;;  %369 = vmatpush.msra.mxu0 %v308_v30 }
  0x97   : > { %711 = vmatpush.msra.mxu1 %v308_v30  ;;  %712 = vmatpush.msra.mxu2 %v308_v30 }
  0x98   : > { %704 = vmatpush.msra.mxu3 %v311_v26  ;;  %370 = vmatpush.msra.mxu0 %v307_v32 }
  0x99   : > { %714 = vmatpush.msra.mxu1 %v307_v32  ;;  %715 = vmatpush.msra.mxu2 %v307_v32 }
  0x9a   : > { %707 = vmatpush.msra.mxu3 %v310_v28 }
  0x9c   : > { %710 = vmatpush.msra.mxu3 %v309_v29 }
  0x9e   : > { %328 = vxpose.xlu0.b32.cont [6/16] %v296_v6, 128  ;;  %713 = vmatpush.msra.mxu3 %v308_v30  ;;  %v282_v6 = vld [vmem:[#allocation2 + $0x48] sm:$0xff] }
  0x9f   : > { %v290_v30 = vld [vmem:[#allocation2 + $0x28] sm:$0xff] }
  0xa0   : > { %716 = vmatpush.msra.mxu3 %v307_v32 }
  0xa6   : > { %329 = vxpose.xlu0.b32.cont [7/16] %v297_v7, 128 }
  0xae   : > { %330 = vxpose.xlu0.b32.cont [8/16] %v298_v8, 128 }
  0xb6   : > { %331 = vxpose.xlu0.b32.cont [9/16] %v299_v9, 128  ;;  %v283_v9 = vld [vmem:[#allocation2 + $0x40] sm:$0xff] }
  0xbe   : > { %332 = vxpose.xlu0.b32.cont [10/16] %v300_v10, 128 }
  0xc6   : > { %333 = vxpose.xlu0.b32.cont [11/16] %v301_v11, 128 }
  0xce   : > { %334 = vxpose.xlu0.b32.cont [12/16] %v302_v12, 128  ;;  %v284_v12 = vld [vmem:[#allocation2 + $0x20] sm:$0xff] }
  0xd6   : > { %335 = vxpose.xlu0.b32.cont [13/16] %v303_v17, 128 }
  0xde   : > { %336 = vxpose.xlu0.b32.cont [14/16] %v304_v22, 128 }
  0xe6   : > { %337 = vxpose.xlu0.b32.cont [15/16] %v305_v27, 128  ;;  %v289_v27 = vld [vmem:[#allocation2 + $0x78] sm:$0xff] }
  0xee   : > { %338 = vxpose.xlu0.b32.end [16/16] %v306_v31, 128 }
 0x11a   : > { %v339_v33 = vpop.trf.xlu0 }
 0x11b   : > { %371 = vmatmul.f32.vlgmr.msra.gmra.mxu0 %v339_v33 }
 0x122   : > { %v340_v34 = vpop.trf.xlu0 }
 0x123   : > { %374 = vmatmul.f32.gmra.mxu0 %v340_v34 }
 0x12a   : > { %v341_v35 = vpop.trf.xlu0 }
 0x12b   : > { %377 = vmatmul.f32.gmra.mxu0 %v341_v35 }
 0x132   : > { %v342_v36 = vpop.trf.xlu0 }
 0x133   : > { %380 = vmatmul.f32.gmra.mxu0 %v342_v36 }
 0x13a   : > { %v343_v37 = vpop.trf.xlu0 }
 0x13b   : > { %383 = vmatmul.f32.vlgmr.msra.gmra.mxu1 %v343_v37 }
 0x142   : > { %v344_v38 = vpop.trf.xlu0 }
 0x143   : > { %386 = vmatmul.f32.gmra.mxu1 %v344_v38 }
 0x14a   : > { %v345_v39 = vpop.trf.xlu0 }
 0x14b   : > { %389 = vmatmul.f32.gmra.mxu1 %v345_v39 }
 0x152   : > { %v346_v40 = vpop.trf.xlu0 }
 0x153   : > { %392 = vmatmul.f32.gmra.mxu1 %v346_v40 }
 0x15a   : > { %v347_v41 = vpop.trf.xlu0 }
 0x15b   : > { %395 = vmatmul.f32.vlgmr.msra.gmra.mxu2 %v347_v41 }
 0x162   : > { %v348_v42 = vpop.trf.xlu0 }
 0x163   : > { %398 = vmatmul.f32.gmra.mxu2 %v348_v42 }
 0x16a   : > { %v349_v43 = vpop.trf.xlu0 }
 0x16b   : > { %401 = vmatmul.f32.gmra.mxu2 %v349_v43 }
 0x172   : > { %v350_v44 = vpop.trf.xlu0 }
 0x173   : > { %404 = vmatmul.f32.gmra.mxu2 %v350_v44 }
 0x17a   : > { %v351_v45 = vpop.trf.xlu0 }
 0x17b   : > { %407 = vmatmul.f32.vlgmr.msra.gmra.mxu3 %v351_v45 }
 0x182   : > { %v352_v46 = vpop.trf.xlu0 }
 0x183   : > { %410 = vmatmul.f32.gmra.mxu3 %v352_v46 }
 0x18a   : > { %v353_v47 = vpop.trf.xlu0 }
 0x18b   : > { %413 = vmatmul.f32.gmra.mxu3 %v353_v47 }
 0x192   : > { %v354_v48 = vpop.trf.xlu0 }
 0x193   : > { %416 = vmatmul.f32.gmra.mxu3 %v354_v48 }
 0x198   : > { %v372_v50 = vpop.f32.mrf.mxu0 }
 0x199   : > { %v420_v51 = vadd.f32 %v372_v50, %v275_v49 }
 0x19b   : > { %436 = vst [vmem:[#allocation2 + $0x30] sm:$0xff] %v420_v51 }
 0x1a0   : > { %v375_v53 = vpop.f32.mrf.mxu0 }
 0x1a1   : > { %v421_v54 = vadd.f32 %v375_v53, %v276_v52 }
 0x1a3   : > { %437 = vst [vmem:[#allocation2] sm:$0xff] %v421_v54 }
 0x1a8   : > { %v378_v56 = vpop.f32.mrf.mxu0 }
 0x1a9   : > { %v422_v57 = vadd.f32 %v378_v56, %v277_v55 }
 0x1ab   : > { %438 = vst [vmem:[#allocation2 + $0x58] sm:$0xff] %v422_v57 }
 0x1b0   : > { %v381_v59 = vpop.f32.mrf.mxu0 }
 0x1b1   : > { %v423_v60 = vadd.f32 %v381_v59, %v278_v58 }
 0x1b3   : > { %439 = vst [vmem:[#allocation2 + $0x18] sm:$0xff] %v423_v60 }
 0x1b8   : > { %v384_v62 = vpop.f32.mrf.mxu1 }
 0x1b9   : > { %v424_v63 = vadd.f32 %v384_v62, %v279_v61 }
 0x1bb   : > { %440 = vst [vmem:[#allocation2 + $0x50] sm:$0xff] %v424_v63 }
 0x1c0   : > { %v387_v1 = vpop.f32.mrf.mxu1 }
 0x1c1   : > { %v425_v2 = vadd.f32 %v387_v1, %v280_v0 }
 0x1c3   : > { %441 = vst [vmem:[#allocation2 + $0x68] sm:$0xff] %v425_v2 }
 0x1c8   : > { %v390_v4 = vpop.f32.mrf.mxu1 }
 0x1c9   : > { %v426_v5 = vadd.f32 %v390_v4, %v281_v3 }
 0x1cb   : > { %442 = vst [vmem:[#allocation2 + $0x8] sm:$0xff] %v426_v5 }
 0x1d0   : > { %v393_v7 = vpop.f32.mrf.mxu1 }
 0x1d1   : > { %v427_v8 = vadd.f32 %v393_v7, %v282_v6 }
 0x1d3   : > { %443 = vst [vmem:[#allocation2 + $0x48] sm:$0xff] %v427_v8 }
 0x1de   : > { %v396_v10 = vpop.f32.mrf.mxu2 }
 0x1df   : > { %v428_v11 = vadd.f32 %v396_v10, %v283_v9 }
 0x1e1   : > { %444 = vst [vmem:[#allocation2 + $0x40] sm:$0xff] %v428_v11 }
 0x1e6   : > { %v399_v13 = vpop.f32.mrf.mxu2 }
 0x1e7   : > { %v429_v14 = vadd.f32 %v399_v13, %v284_v12 }
 0x1e9   : > { %445 = vst [vmem:[#allocation2 + $0x20] sm:$0xff] %v429_v14 }
 0x1ee   : > { %v402_v16 = vpop.f32.mrf.mxu2 }
 0x1ef   : > { %v430_v17 = vadd.f32 %v402_v16, %v285_v15 }
 0x1f1   : > { %446 = vst [vmem:[#allocation2 + $0x10] sm:$0xff] %v430_v17 }
 0x1f6   : > { %v405_v19 = vpop.f32.mrf.mxu2 }
 0x1f7   : > { %v431_v20 = vadd.f32 %v405_v19, %v286_v18 }
 0x1f9   : > { %447 = vst [vmem:[#allocation2 + $0x38] sm:$0xff] %v431_v20 }
 0x1fe   : > { %v408_v22 = vpop.f32.mrf.mxu3 }
 0x1ff   : > { %v432_v23 = vadd.f32 %v408_v22, %v287_v21 }
 0x201   : > { %448 = vst [vmem:[#allocation2 + $0x60] sm:$0xff] %v432_v23 }
 0x206   : > { %v411_v25 = vpop.f32.mrf.mxu3 }
 0x207   : > { %v433_v26 = vadd.f32 %v411_v25, %v288_v24 }
 0x209   : > { %449 = vst [vmem:[#allocation2 + $0x70] sm:$0xff] %v433_v26 }
 0x20e   : > { %v414_v28 = vpop.f32.mrf.mxu3 }
 0x20f   : > { %v434_v29 = vadd.f32 %v414_v28, %v289_v27 }
 0x211   : > { %450 = vst [vmem:[#allocation2 + $0x78] sm:$0xff] %v434_v29 }
 0x215   : > { %455 = sbr.rel (%p658_p8) target bundleno = 555 (0x22b), region = 44 }
 0x216   : > { %v417_v31 = vpop.f32.mrf.mxu3 }
 0x217   : > { %v435_v32 = vadd.f32 %v417_v31, %v290_v30 }
 0x219   : > { %451 = vst [vmem:[#allocation2 + $0x28] sm:$0xff] %v435_v32 }
 0x21a   : > { %v456_v33 = vld [vmem:[#allocation2 + $0x30] sm:$0xff]  ;;  %v457_v34 = vld [vmem:[#allocation2] sm:$0xff]  ;;  %v458_v35 = vld [vmem:[#allocation2 + $0x58] sm:$0xff] }
 0x21b   : > { %472 = vst [vmem:[%s1413_s0] sm:$0xff] %v456_v33  ;;  %v459_v36 = vld [vmem:[#allocation2 + $0x18] sm:$0xff]  ;;  %v460_v37 = vld [vmem:[#allocation2 + $0x50] sm:$0xff]  ;;  %v461_v38 = vld [vmem:[#allocation2 + $0x68] sm:$0xff] }
 0x21c   : > { %473 = vst [vmem:[%s1413_s0 + $0x8] sm:$0xff] %v457_v34  ;;  %v462_v39 = vld [vmem:[#allocation2 + $0x8] sm:$0xff]  ;;  %v464_v41 = vld [vmem:[#allocation2 + $0x40] sm:$0xff]  ;;  %v466_v43 = vld [vmem:[#allocation2 + $0x10] sm:$0xff] }
 0x21d   : > { %474 = vst [vmem:[%s1413_s0 + $0x10] sm:$0xff] %v458_v35  ;;  %v463_v40 = vld [vmem:[#allocation2 + $0x48] sm:$0xff]  ;;  %v465_v42 = vld [vmem:[#allocation2 + $0x20] sm:$0xff]  ;;  %v467_v44 = vld [vmem:[#allocation2 + $0x38] sm:$0xff] }
 0x21e   : > { %475 = vst [vmem:[%s1413_s0 + $0x18] sm:$0xff] %v459_v36  ;;  %v468_v45 = vld [vmem:[#allocation2 + $0x60] sm:$0xff]  ;;  %v469_v46 = vld [vmem:[#allocation2 + $0x70] sm:$0xff]  ;;  %v470_v47 = vld [vmem:[#allocation2 + $0x78] sm:$0xff] }
 0x21f   : > { %476 = vst [vmem:[%s1413_s0 + $0x20] sm:$0xff] %v460_v37 }
 0x220   : > { %477 = vst [vmem:[%s1413_s0 + $0x28] sm:$0xff] %v461_v38  ;;  %v471_v48 = vld [vmem:[#allocation2 + $0x28] sm:$0xff] }
 0x221   : > { %478 = vst [vmem:[%s1413_s0 + $0x30] sm:$0xff] %v462_v39 }
 0x222   : > { %479 = vst [vmem:[%s1413_s0 + $0x38] sm:$0xff] %v463_v40 }
 0x223   : > { %480 = vst [vmem:[%s1413_s0 + $0x40] sm:$0xff] %v464_v41 }
 0x224   : > { %481 = vst [vmem:[%s1413_s0 + $0x48] sm:$0xff] %v465_v42 }
 0x225   : > { %482 = vst [vmem:[%s1413_s0 + $0x50] sm:$0xff] %v466_v43 }
 0x226   : > { %483 = vst [vmem:[%s1413_s0 + $0x58] sm:$0xff] %v467_v44 }
 0x227   : > { %484 = vst [vmem:[%s1413_s0 + $0x60] sm:$0xff] %v468_v45 }
 0x228   : > { %485 = vst [vmem:[%s1413_s0 + $0x68] sm:$0xff] %v469_v46 }
 0x229   : > { %486 = vst [vmem:[%s1413_s0 + $0x70] sm:$0xff] %v470_v47 }
 0x22a   : > { %487 = vst [vmem:[%s1413_s0 + $0x78] sm:$0xff] %v471_v48 }
 0x22b PF: > { %s1622_s9 = sld [smem:[#allocation16_spill]]  ;;  %s505_s19 = sshll.u32 %s1413_s0, 4  ;;  %s506_s19 = int_to_ptr.vmem [resolvable:$true] %s505_s19 }
 0x22c   : > { %s1623_s10 = sld [smem:[#allocation15_spill]]  ;;  %s489_s5 = scalar_lea.sflag [#allocation5], %s249_s2 }
 0x22d   : > { %s1624_s15 = sld [smem:[#allocation17_spill]] }
 0x22e   : > { %s1627_s27 = sld [smem:[#allocation31_spill]] }
 0x231   : > { %s668_s29 = sshll.u32 %s1622_s9, 5 }
 0x232   : > { %s500_s3 = sadd.s32 %s1623_s10, %s668_s29 }
 0x233   : > { %s662_s22 = sshll.u32 %s1624_s15, 6 }
 0x234   : > { %s502_s12 = sadd.s32 %s662_s22, %s500_s3  ;;  %s967_s0 = scalar_lea.hbm %s1627_s27, 1024 }
 0x235   : > { %s663_s7 = sshll.u32 %s502_s12, 3 }
 0x236   : > { %s504_s18 = scalar_lea.hbm %s1627_s27, %s663_s7 }
 0x237   : > { %s507_s30 = sshll.u32 %s504_s18, 4  ;;  %s508_s30 = int_to_ptr.hbm [resolvable:$true] %s507_s30 }
 0x238   : > { %s961_s24 = sshra.s32 %s508_s30, 4  ;;  %s962_s24 = int_to_ptr.hbm [resolvable:$true] %s961_s24 }
 0x239   : > { %s963_s1 = scalar_lea.hbm %s962_s24, 128  ;;  %p968_p10 = scmp.lt.s32.totalorder %s962_s24, %s1627_s27 }
 0x23a   : > { %p964_p12 = scmp.ne.s32.totalorder %s962_s24, %s963_s1  ;;  %p969_p11 = scmp.lt.s32.totalorder %s967_s0, %s963_s1 }
 0x23c   : > { %p965_p4 = pnand %p964_p12, %p1348_p13  ;;  %p970_p5 = por %p969_p11, %p968_p10 }
 0x23e   : > { %p966_p0 = pneg %p965_p4 }
 0x240   : > { %p971_p6 = pnand %p970_p5, %p966_p0 }
 0x242   : > { %974 = shalt.err (!%p971_p6)
}
 0x243   : > { %s1135_s2 = smov 128   ;;  %s1136_s6 = smov 256  }
 0x244   : > { %s1137_s3 = smov 8  }
 0x245   : > { %721 = dma.vmem_to_hbm [thread:$0]  (%p1348_p13), %s506_s19, 2048, %s508_s30, %s489_s5, %s1135_s2, %s1136_s6, %s1137_s3  }
 0x246 PF: > { %s1628_s22 = sld [smem:[#allocation12_spill]]  ;;  %p735_p3 = scmp.ge.s32.totalorder %s1129_s26, 2 }
 0x248   : > { %p731_p2 = pnand %p735_p3, %p1352_p1 }
 0x24a   : > { %p732_p9 = pneg %p731_p2 }
 0x24c   : > { %s522_s7 = sand.u32 1, %s1628_s22  }
 0x24d   : > { %s523_s20 = scalar_lea.sflag [#allocation5], %s522_s7 }
 0x24e   : > { %1056 = dma.done.wait (%p732_p9), %s523_s20, 2048  }
 0x24f   : > { %1058 = vsyncadd (%p732_p9), %s523_s20, 4294965248  ;;  %s21_s26 = sadd.s32 1, %s1129_s26   ;;  %s1631_s9 = sld [smem:[#allocation13_spill]] }
 0x250   : > { %p1489_p7 = scmp.ge.s32.totalorder %s21_s26, 18   ;;  %s1632_s18 = sld [smem:[#allocation18_spill]] }
 0x251   : > { %s1633_s19 = sld [smem:[#allocation19_spill]]  ;;  %s1639_s10 = smov %s1069_s11 }
 0x252   : > { %s1634_s20 = sld [smem:[#allocation20_spill]]  ;;  %s1640_s11 = smov %s1385_s4 }
 0x253   : > { %s1635_s22 = sld [smem:[#allocation21_spill]]  ;;  %s1641_s12 = smov %s1077_s13 }
 0x254   : > { %s1636_s28 = sld [smem:[#allocation23_spill]]  ;;  %s1642_s13 = smov %s1081_s14 }
 0x255   : > { %s1637_s24 = sld [smem:[#allocation25_spill]]  ;;  %s1643_s14 = smov %s1377_s21 }
 0x256   : > { %s1638_s8 = sld [smem:[#allocation28_spill]]  ;;  %s1644_s15 = smov %s1089_s16 }
 0x257   : > { %s1645_s16 = smov %s1093_s17  ;;  %s1646_s17 = smov %s1372_s23 }
 0x258   : > { %s1647_s21 = smov %s1125_s25  ;;  %20 = sbr.rel (!%p1489_p7) target bundleno = 18 (0x12), region = 94 }
 0x25a   : > { %s1648_s23 = smov %s1636_s28 }
 0x25c   : > { %s1649_s25 = smov %s1638_s8 }
 0x25d   :  { %529 = vsyncpa [#allocation4], 1 }
 0x25e   :  { %531 = vsyncpa [#allocation4 + $0x1], 1 }
 0x25f   :  { %532 = vsyncpa [#allocation7], 1 }
 0x260   :  { %534 = vsyncpa [#allocation7 + $0x1], 1 }
 0x261   :  { %535 = vsyncpa [#allocation5], 1 }
 0x262   :  { %537 = vsyncpa [#allocation5 + $0x1], 1 }

</bundles_post_ra>
